<compile_context>
chip_gen: v6e
topology: v6e:2x2x1
jax: 0.10.0
libtpu: 0.0.40
codegen_flags: <defaults>
</compile_context>

<pallas_src>
import functools

import jax
import jax.numpy as jnp
from jax import lax
from jax.experimental import pallas as pl
from jax.experimental.pallas import tpu as pltpu


VMEM_LIMIT = 32 * 1024 * 1024  # safe on v5e/v6e/v7x; tiles below are sized for 64 MiB v7x


# ----------------------------- tiled matmul (no bias) -----------------------------

def _mm_kernel(x_ref, w_ref, o_ref, acc_ref):
    @pl.when(pl.program_id(2) == 0)
    def _():
        acc_ref[...] = jnp.zeros_like(acc_ref)

    acc_ref[...] += jnp.dot(x_ref[...], w_ref[...], preferred_element_type=jnp.float32)

    @pl.when(pl.program_id(2) == pl.num_programs(2) - 1)
    def _():
        o_ref[...] = acc_ref[...]


def _fit(dim, target):
    """Use `target` tile if it divides the dim, else the full dim (no tiling)."""
    return target if dim % target == 0 else dim


def linear_nobias(x, w, *, tm=256, tn=256, tk=512):
    """x: (M, K), w: (K, N) -> (M, N) f32.  bf16 operands, f32 accumulation."""
    M, K = x.shape
    N = w.shape[1]
    tm, tn, tk = _fit(M, tm), _fit(N, tn), _fit(K, tk)
    return pl.pallas_call(
        _mm_kernel,
        out_shape=jax.ShapeDtypeStruct((M, N), jnp.float32),
        grid=(M // tm, N // tn, K // tk),
        in_specs=[
            pl.BlockSpec((tm, tk), lambda i, j, k: (i, k)),
            pl.BlockSpec((tk, tn), lambda i, j, k: (k, j)),
        ],
        out_specs=pl.BlockSpec((tm, tn), lambda i, j, k: (i, j)),
        scratch_shapes=[pltpu.VMEM((tm, tn), jnp.float32)],
        compiler_params=pltpu.CompilerParams(
            dimension_semantics=("parallel", "parallel", "arbitrary"),
            vmem_limit_bytes=VMEM_LIMIT,
        ),
    )(x.astype(jnp.bfloat16), w.astype(jnp.bfloat16))


# ----------------------------- LayerNorm -----------------------------

def _ln_math(x, g, b):
    mu = jnp.mean(x, axis=-1, keepdims=True)
    xc = x - mu
    var = jnp.mean(xc * xc, axis=-1, keepdims=True)
    return xc * lax.rsqrt(var + 1e-5) * g + b


def _ln_kernel(x_ref, g_ref, b_ref, o_ref):
    o_ref[...] = _ln_math(x_ref[...], g_ref[...], b_ref[...])


def layer_norm(x, g, b):
    shp = x.shape
    D = shp[-1]
    x2 = x.reshape(-1, D).astype(jnp.float32)
    M = x2.shape[0]
    tm = _fit(M, 256)
    out = pl.pallas_call(
        _ln_kernel,
        out_shape=jax.ShapeDtypeStruct((M, D), jnp.float32),
        grid=(M // tm,),
        in_specs=[
            pl.BlockSpec((tm, D), lambda i: (i, 0)),
            pl.BlockSpec((1, D), lambda i: (0, 0)),
            pl.BlockSpec((1, D), lambda i: (0, 0)),
        ],
        out_specs=pl.BlockSpec((tm, D), lambda i: (i, 0)),
        compiler_params=pltpu.CompilerParams(
            dimension_semantics=("parallel",),
            vmem_limit_bytes=VMEM_LIMIT,
        ),
    )(x2, g.reshape(1, D).astype(jnp.float32), b.reshape(1, D).astype(jnp.float32))
    return out.reshape(shp)


# ------------------ fused LayerNorm + projection (final heads) ------------------

def _ln_mm_kernel(x_ref, g_ref, b_ref, w_ref, o_ref):
    y = _ln_math(x_ref[...], g_ref[...], b_ref[...])
    o_ref[...] = jnp.dot(y.astype(jnp.bfloat16), w_ref[...],
                         preferred_element_type=jnp.float32)


def ln_linear_nobias(x, g, b, w):
    """x: (M, D) -> LN(x) @ w, fused in one kernel (f32 LN, bf16 matmul, f32 acc)."""
    M, D = x.shape
    N = w.shape[1]
    return pl.pallas_call(
        _ln_mm_kernel,
        out_shape=jax.ShapeDtypeStruct((M, N), jnp.float32),
        compiler_params=pltpu.CompilerParams(vmem_limit_bytes=VMEM_LIMIT),
    )(x.astype(jnp.float32),
      g.reshape(1, D).astype(jnp.float32),
      b.reshape(1, D).astype(jnp.float32),
      w.astype(jnp.bfloat16))


# ----------------------- fused transformer residual block -----------------------

def _block_kernel(x_ref, ln1_g_ref, ln1_b_ref, qkv_w_ref, qkv_b_ref,
                  out_w_ref, out_b_ref, ln2_g_ref, ln2_b_ref,
                  fc_w_ref, fc_b_ref, proj_w_ref, proj_b_ref,
                  o_ref, attn_ref, *, heads, causal):
    x = x_ref[0]                                   # (S, D) f32
    S, D = x.shape
    Dh = D // heads
    scale = 1.0 / float(Dh) ** 0.5

    # ---- LN1 + QKV projection (bf16 matmul, f32 accumulate) ----
    y = _ln_math(x, ln1_g_ref[...], ln1_b_ref[...])
    qkv = jnp.dot(y.astype(jnp.bfloat16), qkv_w_ref[...],
                  preferred_element_type=jnp.float32) + qkv_b_ref[...]
    q = qkv[:, :D] * scale                          # fold attention scale into Q once
    k = qkv[:, D:2 * D]
    v = qkv[:, 2 * D:]

    # causal mask built once per grid step (no HBM mask traffic)
    if causal:
        row = lax.broadcasted_iota(jnp.int32, (S, S), 0)
        col = lax.broadcasted_iota(jnp.int32, (S, S), 1)
        allow = col <= row

    # ---- all heads of this batch element in one grid step ----
    for h in range(heads):
        lo, hi = h * Dh, (h + 1) * Dh
        qh = q[:, lo:hi].astype(jnp.bfloat16)
        kh = k[:, lo:hi].astype(jnp.bfloat16)
        vh = v[:, lo:hi].astype(jnp.bfloat16)
        s = lax.dot_general(qh, kh, (((1,), (1,)), ((), ())),
                            preferred_element_type=jnp.float32)
        if causal:
            s = jnp.where(allow, s, jnp.float32(-1e30))
        s = s - jnp.max(s, axis=-1, keepdims=True)
        p = jnp.exp(s)
        p = p * pl.reciprocal(jnp.sum(p, axis=-1, keepdims=True), approx=True)
        attn_ref[:, lo:hi] = jnp.dot(p.astype(jnp.bfloat16), vh,
                                     preferred_element_type=jnp.float32)

    # ---- output projection + residual (fused) ----
    attn = attn_ref[...]
    x = x + jnp.dot(attn.astype(jnp.bfloat16), out_w_ref[...],
                    preferred_element_type=jnp.float32) + out_b_ref[...]

    # ---- LN2 + MLP (QuickGELU) + residual (fused) ----
    y2 = _ln_math(x, ln2_g_ref[...], ln2_b_ref[...])
    h1 = jnp.dot(y2.astype(jnp.bfloat16), fc_w_ref[...],
                 preferred_element_type=jnp.float32) + fc_b_ref[...]
    h1 = h1 * jax.nn.sigmoid(1.702 * h1)            # QuickGELU, f32
    h2 = jnp.dot(h1.astype(jnp.bfloat16), proj_w_ref[...],
                 preferred_element_type=jnp.float32) + proj_b_ref[...]
    o_ref[0] = x + h2


def residual_block(x, p, *, causal):
    """x: (B, S, D) f32 -> (B, S, D) f32.  Whole block fused in one pallas_call."""
    B, S, D = x.shape
    H = p["heads"]

    def vec_spec(n):
        return pl.BlockSpec((1, n), lambda b: (0, 0))

    def mat_spec(r, c):
        return pl.BlockSpec((r, c), lambda b: (0, 0))

    return pl.pallas_call(
        functools.partial(_block_kernel, heads=H, causal=causal),
        out_shape=jax.ShapeDtypeStruct((B, S, D), jnp.float32),
        grid=(B,),
        in_specs=[
            pl.BlockSpec((1, S, D), lambda b: (b, 0, 0)),   # x
            vec_spec(D), vec_spec(D),                        # ln1 g, b
            mat_spec(D, 3 * D), vec_spec(3 * D),             # qkv w, b
            mat_spec(D, D), vec_spec(D),                     # out w, b
            vec_spec(D), vec_spec(D),                        # ln2 g, b
            mat_spec(D, 4 * D), vec_spec(4 * D),             # fc w, b
            mat_spec(4 * D, D), vec_spec(D),                 # proj w, b
        ],
        out_specs=pl.BlockSpec((1, S, D), lambda b: (b, 0, 0)),
        scratch_shapes=[pltpu.VMEM((S, D), jnp.float32)],
        compiler_params=pltpu.CompilerParams(
            dimension_semantics=("parallel",),
            vmem_limit_bytes=VMEM_LIMIT,
        ),
    )(
        x.astype(jnp.float32),
        p["ln1_g"].reshape(1, D), p["ln1_b"].reshape(1, D),
        p["in_w"], p["in_b"].reshape(1, 3 * D),
        p["out_w"], p["out_b"].reshape(1, D),
        p["ln2_g"].reshape(1, D), p["ln2_b"].reshape(1, D),
        p["fc_w"], p["fc_b"].reshape(1, 4 * D),
        p["proj_w"], p["proj_b"].reshape(1, D),
    )


# ----------------------------- similarity head -----------------------------

def _head_kernel(v_ref, t_ref, ls_ref, vn_ref, tn_ref, sim_ref):
    v = v_ref[...]
    t = t_ref[...]
    # matches the module's normalize(): x / x.norm(dim=-1, keepdim=True)  (no eps)
    vn = v * lax.rsqrt(jnp.sum(v * v, axis=-1, keepdims=True))
    tn = t * lax.rsqrt(jnp.sum(t * t, axis=-1, keepdims=True))
    vn_ref[...] = vn
    tn_ref[...] = tn
    sim_ref[...] = jnp.exp(ls_ref[...]) * lax.dot_general(
        vn, tn, (((1,), (1,)), ((), ())), preferred_element_type=jnp.float32)


# ------------------------ CLIP encoders (glue + kernels) ------------------------

def encode_image(vp, vis):
    # vis: NCHW (B, C, H, W)
    B, C, H, W = vis.shape
    P = vp["patch"]
    gh, gw = H // P, W // P
    width = vp["width"]
    # patch extraction == stride-P conv with PxP kernel, no bias (c, kh, kw ordering)
    patches = (
        vis.reshape(B, C, gh, P, gw, P)
        .transpose(0, 2, 4, 1, 3, 5)
        .reshape(B * gh * gw, C * P * P)
    )
    x = linear_nobias(patches, vp["conv_w"])                       # Pallas tiled matmul
    x = x.reshape(B, gh * gw, width)
    cls = jnp.broadcast_to(vp["class_emb"].reshape(1, 1, width), (B, 1, width))
    x = jnp.concatenate([cls, x], axis=1)                          # (B, N+1, width)
    x = x + vp["pos_emb"][None]
    x = layer_norm(x, vp["ln_pre_g"], vp["ln_pre_b"])
    for blk in vp["blocks"]:
        x = residual_block(x, blk, causal=False)                   # no mask for visual branch
    # fused ln_post + visual projection (single kernel, no intermediate HBM trip)
    return ln_linear_nobias(x[:, 0, :], vp["ln_post_g"], vp["ln_post_b"], vp["proj"])


def encode_text(tp, text):
    B, T = text.shape
    x = tp["tok_emb"][text]                                        # token-embedding gather (glue)
    x = x + tp["pos_emb"][None]
    for blk in tp["blocks"]:
        x = residual_block(x, blk, causal=True)                    # causal mask built in-kernel
    # LN is per-token, so gathering the EOT token first is equivalent to
    # ln_final(full seq) then gather; this lets us fuse ln_final + text_proj.
    eot = jnp.argmax(text, axis=-1)                                # x[arange(B), text.argmax(-1)]
    x = x[jnp.arange(B), eot]
    return ln_linear_nobias(x, tp["ln_final_g"], tp["ln_final_b"], tp["text_proj"])


def pretrained_clip_forward(params, vis, title, comments=None, comment_fusion=None):
    feature_dim = params["feature_dim"]
    shp = vis.shape
    if len(shp) == 2 and shp[1] == feature_dim:
        feats_vis = vis
    elif len(shp) == 4:
        feats_vis = encode_image(params["visual"], vis)
    elif len(shp) == 5:
        fv = encode_image(params["visual"], vis.reshape(shp[0] * shp[1], shp[2], shp[3], shp[4]))
        feats_vis = fv.reshape(shp[0], shp[1], -1).mean(1)
    else:
        raise ValueError("unsupported vis shape")

    feats_title = encode_text(params["text"], title)

    if comments is None or comment_fusion is None or comment_fusion == "None":
        feats_text = feats_title
    elif comment_fusion == "averaging":
        b, ncomms, ntoks = comments.shape
        feats_comm = encode_text(params["text"], comments.reshape(b * ncomms, ntoks)).reshape(
            b, ncomms, feature_dim
        )
        feats_text = jnp.mean(
            jnp.concatenate([feats_title[None], feats_comm.transpose(1, 0, 2)], axis=0), axis=0
        )
    else:
        raise ValueError("Comment fusion method not specified.")

    B_v = feats_vis.shape[0]
    B_t = feats_text.shape[0]
    vn, tn, sim = pl.pallas_call(
        _head_kernel,
        out_shape=(
            jax.ShapeDtypeStruct((B_v, feature_dim), jnp.float32),
            jax.ShapeDtypeStruct((B_t, feature_dim), jnp.float32),
            jax.ShapeDtypeStruct((B_v, B_t), jnp.float32),
        ),
        compiler_params=pltpu.CompilerParams(vmem_limit_bytes=VMEM_LIMIT),
    )(feats_vis.astype(jnp.float32), feats_text.astype(jnp.float32),
      params["logit_scale"].reshape(1, 1).astype(jnp.float32))
    # matches: (normalize(feats_vis), normalize(feats_text), logit_scale.exp() * v @ t.T)
    return vn, tn, sim


# ------------------------------- Parameter init -------------------------------

def _init_block(key, width, heads):
    ks = jax.random.split(key, 6)
    s = 0.02
    bf = jnp.bfloat16  # matmul weights stored bf16 once at init (f32 accumulation in-kernel)
    return {
        "heads": heads,
        "in_w": (s * jax.random.normal(ks[0], (width, 3 * width), jnp.float32)).astype(bf),
        "in_b": jnp.zeros((3 * width,), jnp.float32),
        "out_w": (s * jax.random.normal(ks[1], (width, width), jnp.float32)).astype(bf),
        "out_b": jnp.zeros((width,), jnp.float32),
        "ln1_g": jnp.ones((width,), jnp.float32),
        "ln1_b": jnp.zeros((width,), jnp.float32),
        "ln2_g": jnp.ones((width,), jnp.float32),
        "ln2_b": jnp.zeros((width,), jnp.float32),
        "fc_w": (s * jax.random.normal(ks[2], (width, 4 * width), jnp.float32)).astype(bf),
        "fc_b": jnp.zeros((4 * width,), jnp.float32),
        "proj_w": (s * jax.random.normal(ks[3], (4 * width, width), jnp.float32)).astype(bf),
        "proj_b": jnp.zeros((width,), jnp.float32),
    }


def init_clip_params(key, *, embed_dim=32, image_size=16, patch=8, vis_width=32,
                     vis_layers=2, heads=4, vocab=64, ctx=8, txt_width=32, txt_layers=2,
                     channels=3):
    n_patches = (image_size // patch) ** 2
    keys = jax.random.split(key, 16)
    s = 0.02
    bf = jnp.bfloat16
    visual = {
        "patch": patch,
        "width": vis_width,
        "conv_w": (s * jax.random.normal(keys[0], (channels * patch * patch, vis_width),
                                         jnp.float32)).astype(bf),
        "class_emb": s * jax.random.normal(keys[1], (vis_width,), jnp.float32),
        "pos_emb": s * jax.random.normal(keys[2], (n_patches + 1, vis_width), jnp.float32),
        "ln_pre_g": jnp.ones((vis_width,), jnp.float32),
        "ln_pre_b": jnp.zeros((vis_width,), jnp.float32),
        "blocks": [_init_block(k, vis_width, heads) for k in jax.random.split(keys[3], vis_layers)],
        "ln_post_g": jnp.ones((vis_width,), jnp.float32),
        "ln_post_b": jnp.zeros((vis_width,), jnp.float32),
        "proj": (s * jax.random.normal(keys[4], (vis_width, embed_dim), jnp.float32)).astype(bf),
    }
    text = {
        "width": txt_width,
        "tok_emb": s * jax.random.normal(keys[5], (vocab, txt_width), jnp.float32),
        "pos_emb": s * jax.random.normal(keys[6], (ctx, txt_width), jnp.float32),
        "blocks": [_init_block(k, txt_width, heads) for k in jax.random.split(keys[7], txt_layers)],
        "ln_final_g": jnp.ones((txt_width,), jnp.float32),
        "ln_final_b": jnp.zeros((txt_width,), jnp.float32),
        "text_proj": (s * jax.random.normal(keys[8], (txt_width, embed_dim), jnp.float32)).astype(bf),
    }
    return {
        "feature_dim": embed_dim,
        "visual": visual,
        "text": text,
        "logit_scale": jnp.array(jnp.log(1.0 / 0.07), jnp.float32),
    }


# ------------------------------------ main ------------------------------------

if __name__ == "__main__":
    key = jax.random.PRNGKey(0)
    k_param, k_vis, k_title = jax.random.split(key, 3)

    B, C, H, W = 2, 3, 16, 16
    ctx, vocab = 8, 64

    params = init_clip_params(k_param, image_size=H, channels=C, vocab=vocab, ctx=ctx)

    # layout: vis is NCHW, identical to the PyTorch conv input convention.
    vis = jax.random.normal(k_vis, (B, C, H, W), jnp.float32)
    title = jax.random.randint(k_title, (B, ctx), 1, vocab - 2, jnp.int32)
    # make the last token the largest id (mimics the CLIP EOT token so argmax picks it)
    title = title.at[:, -1].set(vocab - 1)

    feats_vis, feats_text, sim = pretrained_clip_forward(params, vis, title, comments=None)
    jax.block_until_ready((feats_vis, feats_text, sim))

    assert feats_vis.shape == (B, params["feature_dim"])
    assert feats_text.shape == (B, params["feature_dim"])
    assert sim.shape == (B, B)

    # TODO(synk): pretrained CLIP weights / BPE tokenizer not reproduced — synthetic deterministic init only.
    print("KERNEL_OK")
</pallas_src>

<mosaic_0001>
module attributes {stable_mosaic.version = 11 : i64} {
  func.func @_mm_kernel(%arg0: i32, %arg1: i32, %arg2: i32, %arg3: memref<8x192xbf16, #tpu.memory_space<vmem>>, %arg4: memref<192x32xbf16, #tpu.memory_space<vmem>>, %arg5: memref<8x32xf32, #tpu.memory_space<vmem>>, %arg6: memref<8x32xf32, #tpu.memory_space<vmem>>) attributes {dimension_semantics = [#tpu.dimension_semantics<parallel>, #tpu.dimension_semantics<parallel>, #tpu.dimension_semantics<arbitrary>], iteration_bounds = array<i64: 1, 1, 1>, scalar_prefetch = 0 : i64, scratch_operands = 1 : i64, tpu.core_type = #tpu.core_type<tc>, window_params = [{transform_indices = @transform_0, window_bounds = array<i64: 8, 192>}, {transform_indices = @transform_1, window_bounds = array<i64: 192, 32>}, {transform_indices = @transform_2, window_bounds = array<i64: 8, 32>}]} {
    %c0_i32 = arith.constant 0 : i32
    %0 = arith.cmpi eq, %arg2, %c0_i32 : i32
    %1 = arith.extui %0 : i1 to i32
    %c0_i32_0 = arith.constant 0 : i32
    %2 = arith.cmpi ne, %1, %c0_i32_0 : i32
    scf.if %2 {
      %cst_10 = arith.constant 0.000000e+00 : f32
      %12 = vector.broadcast %cst_10 : f32 to vector<8x32xf32>
      %c0_11 = arith.constant 0 : index
      %c0_12 = arith.constant 0 : index
      %13 = vector.load %arg6[%c0_11, %c0_12] : memref<8x32xf32, #tpu.memory_space<vmem>>, vector<8x32xf32>
      tpu.vector_store %arg6[%c0_11, %c0_12], %12 {strides = array<i32>} : memref<8x32xf32, #tpu.memory_space<vmem>>, vector<8x32xf32>,
    } else {
    }
    %c0 = arith.constant 0 : index
    %c0_1 = arith.constant 0 : index
    %3 = vector.load %arg6[%c0, %c0_1] : memref<8x32xf32, #tpu.memory_space<vmem>>, vector<8x32xf32>
    %c0_2 = arith.constant 0 : index
    %c0_3 = arith.constant 0 : index
    %4 = vector.load %arg3[%c0_2, %c0_3] : memref<8x192xbf16, #tpu.memory_space<vmem>>, vector<8x192xbf16>
    %c0_4 = arith.constant 0 : index
    %c0_5 = arith.constant 0 : index
    %5 = vector.load %arg4[%c0_4, %c0_5] : memref<192x32xbf16, #tpu.memory_space<vmem>>, vector<192x32xbf16>
    %cst = arith.constant dense<0.000000e+00> : vector<8x32xf32>
    %6 = tpu.matmul %4, %5, %cst {dimension_numbers = #tpu.dot_dimension_numbers<[1], [0], [0], [1], [0, 0, 1, 1], [], []>} : vector<8x192xbf16>, vector<192x32xbf16>, vector<8x32xf32> -> vector<8x32xf32>
    %7 = arith.addf %3, %6 : vector<8x32xf32>
    %c0_6 = arith.constant 0 : index
    %c0_7 = arith.constant 0 : index
    %8 = vector.load %arg6[%c0_6, %c0_7] : memref<8x32xf32, #tpu.memory_space<vmem>>, vector<8x32xf32>
    tpu.vector_store %arg6[%c0_6, %c0_7], %7 {strides = array<i32>} : memref<8x32xf32, #tpu.memory_space<vmem>>, vector<8x32xf32>,
    %c0_i32_8 = arith.constant 0 : i32
    %9 = arith.cmpi eq, %arg2, %c0_i32_8 : i32
    %10 = arith.extui %9 : i1 to i32
    %c0_i32_9 = arith.constant 0 : i32
    %11 = arith.cmpi ne, %10, %c0_i32_9 : i32
    scf.if %11 {
      %c0_10 = arith.constant 0 : index
      %c0_11 = arith.constant 0 : index
      %12 = vector.load %arg6[%c0_10, %c0_11] : memref<8x32xf32, #tpu.memory_space<vmem>>, vector<8x32xf32>
      %c0_12 = arith.constant 0 : index
      %c0_13 = arith.constant 0 : index
      %13 = vector.load %arg5[%c0_12, %c0_13] : memref<8x32xf32, #tpu.memory_space<vmem>>, vector<8x32xf32>
      tpu.vector_store %arg5[%c0_12, %c0_13], %12 {strides = array<i32>} : memref<8x32xf32, #tpu.memory_space<vmem>>, vector<8x32xf32>,
    } else {
    }
    return
  }
  func.func @transform_0(%arg0: i32, %arg1: i32, %arg2: i32) -> (i32, i32) {
    %c0_i32 = arith.constant 0 : i32
    return %arg0, %arg2 : i32, i32
  }
  func.func @transform_1(%arg0: i32, %arg1: i32, %arg2: i32) -> (i32, i32) {
    %c0_i32 = arith.constant 0 : i32
    return %arg2, %arg1 : i32, i32
  }
  func.func @transform_2(%arg0: i32, %arg1: i32, %arg2: i32) -> (i32, i32) {
    %c0_i32 = arith.constant 0 : i32
    return %arg0, %arg1 : i32, i32
  }
}

</mosaic_0001>

<bundles_post_ra>
// kernel: tpu_custom_call.1
= control target key start
LH: loop header
LB: loop body
LE: loop exit
PB: predicated region body
PF: predicated region fallthrough
CT: control target
= control target key end

     0   :  { %v243_v1 = vmov 0   ;;  %vm17_vm0 = vcmask 261120   ;;  %v244_v3 = vmov 0.0   ;;  %vm123_vm1 = vcmask 523264   ;;  %s306_s0 = inlined_call_operand.vmem [shape: bf16[8,192], index: 0, kind: input, shape index: {}]   ;;  %s307_s1 = inlined_call_operand.vmem [shape: bf16[192,32], index: 1, kind: input, shape index: {}]   ;;  %s308_s2 = inlined_call_operand.hbm [shape: f32[8,32], index: 2, kind: output, shape index: {}]  }
   0x1   :  { %v207_v0 = vld [vmem:[%s307_s1 + $0x38] sm:$0xff]   ;;  %127 = vmatprep.subr.bf16.mxu0 %v243_v1  ;;  %v208_v2 = vld [vmem:[%s307_s1 + $0x30] sm:$0xff]   ;;  %18 = vst.msk [vmem:[#allocation2] sm:$0xff] %vm17_vm0, %v244_v3  ;;  %v209_v4 = vld [vmem:[%s307_s1 + $0x28] sm:$0xff]  }
   0x2   :  { %128 = vmatpush1.bf16.msra.mxu0 %v207_v0  ;;  %v210_v5 = vld [vmem:[%s307_s1 + $0x20] sm:$0xff]  }
   0x3   :  { %129 = vmatprep.subr.bf16.mxu0 %v243_v1  ;;  %v20_v6 = vld [vmem:[%s306_s0] sm:$0xff] }
   0x6   :  { %130 = vmatpush1.bf16.msra.mxu0 %v208_v2 }
   0x7   :  { %131 = vmatprep.subr.bf16.mxu0 %v243_v1 }
   0xa   :  { %132 = vmatpush1.bf16.msra.mxu0 %v209_v4 }
   0xb   :  { %133 = vmatprep.subr.bf16.mxu0 %v243_v1 }
   0xc   :  { %7 = vsyncpa [#allocation4], 0  ;;  %v190_v7 = vcombine.high %v20_v6, %v20_v6  ;;  %v211_v8 = vld [vmem:[%s307_s1 + $0x18] sm:$0xff]   ;;  %v212_v9 = vld [vmem:[%s307_s1 + $0x10] sm:$0xff]   ;;  %v189_v16 = vcombine.low %v20_v6, %v20_v6  ;;  %s245_s6 = smov [#allocation3]  }
   0xd   :  { %v213_v10 = vld [vmem:[%s307_s1 + $0x8] sm:$0xff]   ;;  %v214_v11 = vld [vmem:[%s307_s1] sm:$0xff]   ;;  %v215_v12 = vld [vmem:[%s307_s1 + $0x58] sm:$0xff]   ;;  %s181_s7 = sshll.u32 %s245_s6, 4  ;;  %s182_s7 = int_to_ptr.vmem [resolvable:$true] %s181_s7 }
   0xe   :  { %134 = vmatpush1.bf16.msra.mxu0 %v210_v5  ;;  %203 = vmatprep.mubr.msk.bf16.mxu0 %vm123_vm1, %v190_v7  ;;  %v216_v13 = vld [vmem:[%s307_s1 + $0x50] sm:$0xff]   ;;  %v217_v14 = vld [vmem:[%s307_s1 + $0x48] sm:$0xff]   ;;  %v218_v15 = vld [vmem:[%s307_s1 + $0x40] sm:$0xff]   ;;  %s221_s8 = scalar_lea.vmem %s182_s7, 128  ;;  %p226_p1 = scmp.lt.s32.totalorder %s182_s7, %s182_s7 }
   0xf   :  { %135 = vmatprep.subr.bf16.mxu0 %v243_v1  ;;  %v19_v17 = vld [vmem:[#allocation2] sm:$0xff]  ;;  %p222_p0 = scmp.ne.s32.totalorder %s182_s7, %s221_s8  ;;  %p227_p2 = scmp.lt.s32.totalorder %s221_s8, %s221_s8 }
  0x11   :  { %p228_p3 = por %p227_p2, %p226_p1 }
  0x12   :  { %136 = vmatpush1.bf16.msra.mxu0 %v211_v8 }
  0x13   :  { %137 = vmatprep.subr.bf16.mxu0 %v243_v1  ;;  %p229_p4 = pnand %p228_p3, %p222_p0 }
  0x16   :  { %138 = vmatpush1.bf16.msra.mxu0 %v212_v9 }
  0x17   :  { %139 = vmatprep.subr.bf16.mxu0 %v243_v1 }
  0x1a   :  { %140 = vmatpush1.bf16.msra.mxu0 %v213_v10 }
  0x1b   :  { %141 = vmatprep.subr.bf16.mxu0 %v243_v1 }
  0x1e   :  { %142 = vmatpush1.bf16.msra.mxu0 %v214_v11 }
  0x1f   :  { %151 = vmatprep.subr.bf16.mxu0 %v243_v1 }
  0x22   :  { %152 = vmatpush2.bf16.msra.mxu0 %v215_v12 }
  0x23   :  { %153 = vmatprep.subr.bf16.mxu0 %v243_v1 }
  0x26   :  { %154 = vmatpush2.bf16.msra.mxu0 %v216_v13 }
  0x27   :  { %155 = vmatprep.subr.bf16.mxu0 %v243_v1 }
  0x2a   :  { %156 = vmatpush2.bf16.msra.mxu0 %v217_v14 }
  0x2b   :  { %157 = vmatprep.subr.bf16.mxu0 %v243_v1 }
  0x2e   :  { %158 = vmatpush2.bf16.msra.mxu0 %v218_v15 }
  0x31   :  { %160 = vmatmul.mubr.bf16.vlgmr.msra.gmra.mxu0 %v189_v16 }
  0xf1   :  { %v161_v18 = vpop.f32.mrf.mxu0 }
  0xf2   :  { %v167_v19 = vadd.f32 %v161_v18, %v19_v17 }
  0xf3   :  { %v163_v20 = vpop.f32.mrf.mxu0 }
  0xf4   :  { %169 = vst.msk [vmem:[#allocation2] sm:$0xff] %vm17_vm0, %v167_v19 }
  0xf5   :  { %v164_v21 = vpop.f32.mrf.mxu0 }
  0xf7   :  { %v165_v22 = vpop.f32.mrf.mxu0 }
  0xfb   :  { %v173_v23 = vld [vmem:[#allocation2] sm:$0xff] }
  0xfc   :  { %174 = vst.msk [vmem:[#allocation3] sm:$0xff] %vm17_vm0, %v173_v23 }
  0xfd   :  { %232 = shalt.err (!%p229_p4)
}
  0xfe   :  { %184 = dma.vmem_to_hbm [thread:$0]  %s182_s7, 128, %s308_s2, [#allocation4]  }
  0xff   :  { %241 = dma.done.wait [#allocation4], 128  }
 0x100   :  { %242 = vsyncadd [#allocation4], 4294967168 }
 0x101   :  { %188 = vsyncpa [#allocation4], 1 }

</bundles_post_ra>
